<compile_context>
chip_gen: v6e
topology: v6e:2x2x1
jax: 0.10.0
libtpu: 0.0.40
codegen_flags: <defaults>
</compile_context>

<pallas_src>
import jax
import jax.numpy as jnp
from jax.experimental import pallas as pl
from jax.experimental.pallas import tpu as pltpu


# ---------------------------------------------------------------------------
# Tuning constants.
# ---------------------------------------------------------------------------
MAX_UID_TILE = 2048     # uids per grid step (co-tuned with capacity below)
MIN_UID_TILE = 256      # keeps the output last dim a multiple of 128 (lane-dense)
MIN_CAPACITY = 128      # power-of-two table capacity, always a multiple of 128

# Conservative per-TensorCore working-set target: with dimension_semantics
# ("parallel", ...) each core holds its OWN copy of the resident table +
# one-hot intermediate + output buffers, and v7x has only 64 MiB VMEM per TC.
WORKSET_BUDGET_BYTES = 20 * 1024 * 1024
# Explicit scoped-VMEM request: raises v5e's 16 MiB default, stays at the
# v6e/v7x 32 MiB default (well under v7x's 64 MiB physical per TC).
VMEM_LIMIT_BYTES = 32 * 1024 * 1024


def _next_pow2(x: int) -> int:
    p = 1
    while p < x:
        p *= 2
    return p


def _round_up(x: int, m: int) -> int:
    return ((x + m - 1) // m) * m


# ---------------------------------------------------------------------------
# Kernels.
# ---------------------------------------------------------------------------
def _pkm_gather_resident_kernel(uids_ref, keys_t_ref, out_ref):
    """One-hot MXU gather against the full VMEM-resident transposed keys table.

    uids_ref  : (1, TILE)           int32   (lane-dense)
    keys_t_ref: (key_dim, capacity) float32 (full array, single VMEM copy)
    out_ref   : (key_dim, TILE)     float32 (lane-dense: last dim multiple of 128)
    """
    cap = keys_t_ref.shape[1]
    tile = out_ref.shape[1]
    uid = uids_ref[...]                                            # (1, TILE)
    row = jax.lax.broadcasted_iota(jnp.int32, (cap, tile), 0)      # (cap, TILE)
    onehot_t = (row == uid).astype(keys_t_ref.dtype)               # (cap, TILE)
    out_ref[...] = jnp.dot(
        keys_t_ref[...], onehot_t, preferred_element_type=jnp.float32
    ).astype(out_ref.dtype)


def _pkm_gather_blocked_kernel(uids_ref, keys_t_ref, out_ref):
    """Capacity-blocked fallback for large tables.

    grid = (uid_tiles, cap_tiles).  The output block index is constant across
    the trailing "arbitrary" capacity axis, so it stays resident in VMEM as the
    accumulator.  Exactly one capacity tile hits each uid (0/1 weights), so the
    running sum is an exact row selection.
    """
    k = pl.program_id(1)
    tk = keys_t_ref.shape[1]
    tile = out_ref.shape[1]

    @pl.when(k == 0)
    def _():
        out_ref[...] = jnp.zeros_like(out_ref)

    uid = uids_ref[...]                                            # (1, TILE)
    row = jax.lax.broadcasted_iota(jnp.int32, (tk, tile), 0) + k * tk
    onehot_t = (row == uid).astype(keys_t_ref.dtype)               # (TK, TILE)
    out_ref[...] += jnp.dot(
        keys_t_ref[...], onehot_t, preferred_element_type=jnp.float32
    ).astype(out_ref.dtype)


# ---------------------------------------------------------------------------
# Wrapper.
# ---------------------------------------------------------------------------
def _choose_plan(n: int, capacity: int, key_dim: int, budget: int):
    """Pick (uid_tile, cap_tile, resident) so the per-step working set fits `budget`."""
    itemsize = 4  # f32 table / one-hot / output, int32 uids
    tile = max(MIN_UID_TILE, min(MAX_UID_TILE, _round_up(max(n, 1), MIN_UID_TILE)))
    # Always present: double-buffered uid blocks + double-buffered output blocks.
    fixed = 2 * tile * itemsize + 2 * key_dim * tile * itemsize
    # Resident path: single copy of the full transposed table + full one-hot LHS.
    resident_bytes = key_dim * capacity * itemsize + capacity * tile * itemsize + fixed
    if resident_bytes <= budget:
        return tile, capacity, True
    # Streaming path: largest power-of-two capacity tile whose per-step set fits
    # (keys tiles are double-buffered on purpose here -- they are streamed).
    tk = capacity
    while tk > 128:
        step_bytes = 2 * key_dim * tk * itemsize + tk * tile * itemsize + fixed
        if step_bytes <= budget:
            break
        tk //= 2
    return tile, tk, False


def pkm_gather(keys_t_padded: jnp.ndarray, uids_flat: jnp.ndarray, *,
               workset_budget_bytes: int = WORKSET_BUDGET_BYTES) -> jnp.ndarray:
    """Gather columns of the (key_dim, capacity) padded transposed table at `uids_flat`.

    Returns (N, key_dim).  uids pointing into the zero padding (>= real n_keys)
    yield zero rows (masked OOB, same as the previous kernel).
    """
    key_dim, capacity = keys_t_padded.shape
    n = uids_flat.shape[0]

    tile, tk, resident = _choose_plan(n, capacity, key_dim, workset_budget_bytes)

    n_tiles = pl.cdiv(n, tile)
    n_pad = n_tiles * tile
    uids2d = jnp.pad(uids_flat.astype(jnp.int32), (0, n_pad - n)).reshape(1, n_pad)

    if resident:
        grid_spec = pltpu.PrefetchScalarGridSpec(
            num_scalar_prefetch=0,
            grid=(n_tiles,),
            in_specs=[
                pl.BlockSpec((1, tile), lambda i: (0, i)),              # lane-dense uids
                pl.BlockSpec(memory_space=pltpu.MemorySpace.VMEM),      # full table, 1 copy
            ],
            out_specs=pl.BlockSpec((key_dim, tile), lambda i: (0, i)),  # lane-dense output
        )
        kernel = _pkm_gather_resident_kernel
        dims = ("parallel",)
        keys_reads = 1
    else:
        cap_tiles = capacity // tk
        grid_spec = pltpu.PrefetchScalarGridSpec(
            num_scalar_prefetch=0,
            grid=(n_tiles, cap_tiles),
            in_specs=[
                pl.BlockSpec((1, tile), lambda i, k: (0, i)),
                pl.BlockSpec((key_dim, tk), lambda i, k: (0, k)),
            ],
            out_specs=pl.BlockSpec((key_dim, tile), lambda i, k: (0, i)),
        )
        kernel = _pkm_gather_blocked_kernel
        dims = ("parallel", "arbitrary")
        keys_reads = n_tiles

    cost = pl.CostEstimate(
        flops=2 * n_pad * key_dim,                          # useful work: one row per uid
        transcendentals=0,
        bytes_accessed=(key_dim * capacity * 4 * keys_reads  # keys table
                        + n_pad * 4                          # uids (counted once)
                        + key_dim * n_pad * 4),              # output
    )

    out_t = pl.pallas_call(
        kernel,
        out_shape=jax.ShapeDtypeStruct((key_dim, n_pad), keys_t_padded.dtype),
        grid_spec=grid_spec,
        compiler_params=pltpu.CompilerParams(
            dimension_semantics=dims,
            vmem_limit_bytes=VMEM_LIMIT_BYTES,
        ),
        cost_estimate=cost,
    )(uids2d, keys_t_padded)

    # Single wrapper-side transpose back to (N, key_dim); a downstream PKM
    # scoring matmul could consume the transposed layout directly instead.
    return out_t[:, :n].T


# ---------------------------------------------------------------------------
# Module.
# ---------------------------------------------------------------------------
class PKMKeysJAX:
    """JAX/Pallas port of PKMKeys.  Deterministic parameter init in-script."""

    def __init__(self, key_dim: int, seed: int = 0):
        self._key_dim = key_dim
        self._n_keys = 10
        self._rng = jax.random.PRNGKey(seed)
        self._rng, sub = jax.random.split(self._rng)
        # torch.rand -> uniform [0, 1), float32
        self._keys = jax.random.uniform(
            sub, (self._n_keys, self._key_dim), dtype=jnp.float32
        )
        self._keys_t_padded = self._pad_transpose(self._keys)

    def _pad_transpose(self, keys: jnp.ndarray) -> jnp.ndarray:
        # Capacity-padded, transposed copy kept as module state so the hot path
        # never re-pads/copies the table; rebuilt only at growth events.
        n_keys = keys.shape[0]
        capacity = max(MIN_CAPACITY, _next_pow2(n_keys))
        return jnp.pad(keys.T, ((0, 0), (0, capacity - n_keys)))

    def forward(self, uids: jnp.ndarray) -> jnp.ndarray:
        # Stateful, data-dependent table growth (Python-level, as in the spec).
        # TODO(synk): int(jnp.max(uids)) forces a host-device sync each call; it is
        #             required by the module's stateful growth semantics.
        max_uid = int(jnp.max(uids))
        if max_uid >= self._n_keys - 1:
            n_new = max_uid - self._n_keys + 10
            self._rng, sub = jax.random.split(self._rng)
            new_keys = jax.random.uniform(
                sub, (n_new, self._key_dim), dtype=jnp.float32
            )
            self._keys = jnp.concatenate([self._keys, new_keys], axis=0)
            self._n_keys = self._keys.shape[0]
            self._keys_t_padded = self._pad_transpose(self._keys)

        uids_flat = jnp.reshape(uids, (-1,)).astype(jnp.int32)
        out_flat = pkm_gather(self._keys_t_padded, uids_flat)
        return jnp.reshape(out_flat, uids.shape + (self._key_dim,))


if __name__ == "__main__":
    key_dim = 32
    batch = 8

    module = PKMKeysJAX(key_dim=key_dim, seed=0)

    root = jax.random.PRNGKey(0)
    uid_key, tbl_key, uid2_key = jax.random.split(root, 3)

    # Deterministic example uids; include values >= 9 to exercise table growth.
    uids = jax.random.randint(uid_key, (batch,), minval=0, maxval=20, dtype=jnp.int32)

    out = module.forward(uids)
    out = jax.block_until_ready(out)

    # Reference check against plain-JAX gather on the (grown) table.
    ref = module._keys[uids]
    assert out.shape == (batch, key_dim), out.shape
    assert jnp.allclose(out, ref), "mismatch vs reference gather (resident path)"

    # Also exercise the capacity-blocked streaming fallback with a forced tiny
    # working-set budget (capacity 512, TK 128 -> 4 accumulation steps).
    big_keys = jax.random.uniform(tbl_key, (300, key_dim), dtype=jnp.float32)
    big_cap = max(MIN_CAPACITY, _next_pow2(big_keys.shape[0]))
    big_keys_t = jnp.pad(big_keys.T, ((0, 0), (0, big_cap - big_keys.shape[0])))
    uids2 = jax.random.randint(uid2_key, (64,), minval=0, maxval=300, dtype=jnp.int32)
    out2 = jax.block_until_ready(
        pkm_gather(big_keys_t, uids2, workset_budget_bytes=300 * 1024)
    )
    assert jnp.allclose(out2, big_keys[uids2]), "mismatch vs reference gather (streaming path)"

    print("KERNEL_OK")
</pallas_src>

<mosaic_0001>
module attributes {stable_mosaic.version = 11 : i64} {
  func.func @_pkm_gather_resident_kernel(%arg0: i32, %arg1: memref<1x256xi32, #tpu.memory_space<vmem>>, %arg2: memref<32x128xf32, #tpu.memory_space<vmem>>, %arg3: memref<32x256xf32, #tpu.memory_space<vmem>>) attributes {dimension_semantics = [#tpu.dimension_semantics<parallel>], iteration_bounds = array<i64: 1>, scalar_prefetch = 0 : i64, scratch_operands = 0 : i64, tpu.core_type = #tpu.core_type<tc>, window_params = [{transform_indices = @transform_0, window_bounds = array<i64: 1, 256>}, {pipeline_mode = #tpu.pipeline_mode<synchronous>, transform_indices = @transform_1, window_bounds = array<i64: 32, 128>}, {transform_indices = @transform_2, window_bounds = array<i64: 32, 256>}]} {
    %c0 = arith.constant 0 : index
    %c0_0 = arith.constant 0 : index
    %0 = vector.load %arg1[%c0, %c0_0] : memref<1x256xi32, #tpu.memory_space<vmem>>, vector<1x256xi32>
    %1 = tpu.iota {dimensions = array<i32: 0>} : vector<128x256xi32>
    %2 = vector.broadcast %0 : vector<1x256xi32> to vector<128x256xi32>
    %3 = arith.cmpi eq, %1, %2 : vector<128x256xi32>
    %4 = arith.extui %3 : vector<128x256xi1> to vector<128x256xi32>
    %5 = arith.sitofp %4 : vector<128x256xi32> to vector<128x256xf32>
    %c0_1 = arith.constant 0 : index
    %c0_2 = arith.constant 0 : index
    %6 = vector.load %arg2[%c0_1, %c0_2] : memref<32x128xf32, #tpu.memory_space<vmem>>, vector<32x128xf32>
    %cst = arith.constant dense<0.000000e+00> : vector<32x256xf32>
    %7 = tpu.matmul %6, %5, %cst {dimension_numbers = #tpu.dot_dimension_numbers<[1], [0], [0], [1], [0, 0, 1, 1], [], []>} : vector<32x128xf32>, vector<128x256xf32>, vector<32x256xf32> -> vector<32x256xf32>
    %c0_3 = arith.constant 0 : index
    %c0_4 = arith.constant 0 : index
    %8 = vector.load %arg3[%c0_3, %c0_4] : memref<32x256xf32, #tpu.memory_space<vmem>>, vector<32x256xf32>
    tpu.vector_store %arg3[%c0_3, %c0_4], %7 {strides = array<i32>} : memref<32x256xf32, #tpu.memory_space<vmem>>, vector<32x256xf32>,
    return
  }
  func.func @transform_0(%arg0: i32) -> (i32, i32) {
    %c0_i32 = arith.constant 0 : i32
    %c0_i32_0 = arith.constant 0 : i32
    return %c0_i32, %arg0 : i32, i32
  }
  func.func @transform_1(%arg0: i32) -> (i32, i32) {
    %c0_i32 = arith.constant 0 : i32
    %c0_i32_0 = arith.constant 0 : i32
    %c0_i32_1 = arith.constant 0 : i32
    return %c0_i32, %c0_i32_0 : i32, i32
  }
  func.func @transform_2(%arg0: i32) -> (i32, i32) {
    %c0_i32 = arith.constant 0 : i32
    %c0_i32_0 = arith.constant 0 : i32
    return %c0_i32, %arg0 : i32, i32
  }
}

</mosaic_0001>

<bundles_post_ra>
// kernel: tpu_custom_call.1
= control target key start
LH: loop header
LB: loop body
LE: loop exit
PB: predicated region body
PF: predicated region fallthrough
CT: control target
= control target key end

     0   :  { %7 = vsyncpa [#allocation3], 0  ;;  %s608_s0 = inlined_call_operand.hbm [shape: s32[1,256], index: 0, kind: input, shape index: {}]   ;;  %s609_s1 = inlined_call_operand.hbm [shape: f32[32,128], index: 1, kind: input, shape index: {}]   ;;  %s610_s2 = inlined_call_operand.hbm [shape: f32[32,256], index: 2, kind: output, shape index: {}]  }
   0x1   :  { %8 = vsyncpa [#allocation6], 0 }
   0x2   :  { %9 = vsyncpa [#allocation4], 0  ;;  %s450_s9 = smov [#allocation2]   ;;  %s451_s11 = smov [#allocation5]  }
   0x3   :  { %s16_s10 = sshll.u32 %s450_s9, 4  ;;  %s25_s12 = sshll.u32 %s451_s11, 4  ;;  %s17_s10 = int_to_ptr.vmem [resolvable:$true] %s16_s10  ;;  %s26_s12 = int_to_ptr.vmem [resolvable:$true] %s25_s12 }
   0x4   :  { %s392_s13 = scalar_lea.vmem %s17_s10, 32  ;;  %p397_p1 = scmp.lt.s32.totalorder %s17_s10, %s17_s10 }
   0x5   :  { %p393_p0 = scmp.ne.s32.totalorder %s17_s10, %s392_s13  ;;  %p398_p2 = scmp.lt.s32.totalorder %s392_s13, %s392_s13 }
   0x7   :  { %p399_p3 = por %p398_p2, %p397_p1 }
   0x9   :  { %p400_p4 = pnand %p399_p3, %p393_p0 }
   0xb   :  { %403 = shalt.err (!%p400_p4)
}
   0xc   :  { %19 = dma.hbm_to_vmem [thread:$0]  %s608_s0, 32, %s17_s10, [#allocation3]  }
   0xd   :  { %s412_s16 = scalar_lea.vmem %s26_s12, 512  ;;  %p417_p6 = scmp.lt.s32.totalorder %s26_s12, %s26_s12 }
   0xe   :  { %p413_p5 = scmp.ne.s32.totalorder %s26_s12, %s412_s16  ;;  %p418_p7 = scmp.lt.s32.totalorder %s412_s16, %s412_s16 }
  0x10   :  { %p419_p8 = por %p418_p7, %p417_p6 }
  0x12   :  { %p420_p9 = pnand %p419_p8, %p413_p5 }
  0x14   :  { %423 = shalt.err (!%p420_p9)
}
  0x15   :  { %s452_s17 = smov 128   ;;  %s453_s18 = smov 8  }
  0x16   :  { %31 = dma.hbm_to_vmem [thread:$0]  %s609_s1, 512, %s26_s12, [#allocation6], %s452_s17, %s452_s17, %s453_s18  }
  0x17   :  { %444 = dma.done.wait [#allocation3], 32  }
  0x18   :  { %445 = vsyncadd [#allocation3], 4294967264 }
  0x19   :  { %446 = dma.done.wait [#allocation6], 512  }
  0x1a   :  { %447 = vsyncadd [#allocation6], 4294966784  ;;  %v39_v0 = vlaneseq  ;;  %v454_v1 = vmov 0.0   ;;  %v38_v7 = vld [vmem:[#allocation2] sm:$0x3]  ;;  %v455_v12 = vmov 1.0  }
  0x1b   :  { %228 = vmatprep.mubr.f32.mxu0 %v454_v1  ;;  %240 = vmatprep.mubr.f32.mxu1 %v454_v1  ;;  %v160_v24 = vld [vmem:[#allocation5] sm:$0xff]  ;;  %v162_v25 = vld [vmem:[#allocation5 + $0x10] sm:$0xff]  ;;  %v161_v26 = vld [vmem:[#allocation5 + $0x8] sm:$0xff]  ;;  %s456_s0 = smov [#allocation7]  }
  0x1c   :  { %v482_v2 = vshrl.u32 %v39_v0, 7  ;;  %v163_v27 = vld [vmem:[#allocation5 + $0x18] sm:$0xff]  ;;  %s266_s1 = sshll.u32 %s456_s0, 4  ;;  %s267_s1 = int_to_ptr.vmem [resolvable:$true] %s266_s1 }
  0x1d   :  { %s424_s21 = scalar_lea.vmem %s267_s1, 1024  ;;  %p429_p11 = scmp.lt.s32.totalorder %s267_s1, %s267_s1 }
  0x1e   :  { %v62_v3 = vsub.s32 1, %v482_v2  ;;  %v58_v4 = vsub.s32 0, %v482_v2  ;;  %v55_v5 = vadd.s32 120, %v482_v2  ;;  %v54_v6 = vadd.s32 112, %v482_v2  ;;  %p425_p10 = scmp.ne.s32.totalorder %s267_s1, %s424_s21  ;;  %p430_p12 = scmp.lt.s32.totalorder %s424_s21, %s424_s21 }
  0x1f   :  { %v53_v10 = vadd.s32 104, %v482_v2  ;;  %v52_v11 = vadd.s32 96, %v482_v2  ;;  %v51_v13 = vadd.s32 88, %v482_v2  ;;  %v50_v14 = vadd.s32 80, %v482_v2 }
  0x20   :  { %v488_v8 = vrot.slane %v38_v7, %v62_v3  ;;  %v490_v9 = vrot.slane %v38_v7, %v58_v4  ;;  %v49_v15 = vadd.s32 72, %v482_v2  ;;  %v48_v16 = vadd.s32 64, %v482_v2  ;;  %p431_p13 = por %p430_p12, %p429_p11 }
  0x21   :  { %v47_v17 = vadd.s32 56, %v482_v2  ;;  %v46_v18 = vadd.s32 48, %v482_v2  ;;  %v45_v19 = vadd.s32 40, %v482_v2  ;;  %v44_v20 = vadd.s32 32, %v482_v2 }
  0x22   :  { %vm95_vm0 = vcmp.eq.s32.totalorder %v55_v5, %v488_v8  ;;  %vm94_vm1 = vcmp.eq.s32.totalorder %v55_v5, %v490_v9  ;;  %vm93_vm2 = vcmp.eq.s32.totalorder %v54_v6, %v488_v8  ;;  %vm92_vm3 = vcmp.eq.s32.totalorder %v54_v6, %v490_v9  ;;  %p432_p0 = pnand %p431_p13, %p425_p10 }
  0x23   :  { %311 = vmatprep.subr.msk.mxu0 %vm95_vm0, %v455_v12  ;;  %343 = vmatprep.subr.msk.mxu1 %vm95_vm0, %v455_v12  ;;  %vm91_vm4 = vcmp.eq.s32.totalorder %v53_v10, %v488_v8  ;;  %vm90_vm5 = vcmp.eq.s32.totalorder %v53_v10, %v490_v9  ;;  %vm89_vm6 = vcmp.eq.s32.totalorder %v52_v11, %v488_v8  ;;  %v43_v21 = vadd.s32 24, %v482_v2 }
  0x24   :  { %312 = vmatpush1.msk.msra.mxu0 %vm94_vm1, %v455_v12  ;;  %359 = vmatpush1.msk.msra.mxu1 %vm94_vm1, %v455_v12  ;;  %vm88_vm7 = vcmp.eq.s32.totalorder %v52_v11, %v490_v9  ;;  %vm87_vm8 = vcmp.eq.s32.totalorder %v51_v13, %v488_v8  ;;  %vm86_vm9 = vcmp.eq.s32.totalorder %v51_v13, %v490_v9  ;;  %v42_v22 = vadd.s32 16, %v482_v2 }
  0x25   :  { %313 = vmatprep.subr.msk.mxu0 %vm93_vm2, %v455_v12  ;;  %344 = vmatprep.subr.msk.mxu1 %vm93_vm2, %v455_v12  ;;  %vm85_vm10 = vcmp.eq.s32.totalorder %v50_v14, %v488_v8  ;;  %vm84_vm11 = vcmp.eq.s32.totalorder %v50_v14, %v490_v9  ;;  %vm83_vm12 = vcmp.eq.s32.totalorder %v49_v15, %v488_v8  ;;  %v41_v23 = vadd.s32 8, %v482_v2 }
  0x26   :  { %314 = vmatpush1.msk.msra.mxu0 %vm92_vm3, %v455_v12  ;;  %360 = vmatpush1.msk.msra.mxu1 %vm92_vm3, %v455_v12  ;;  %vm82_vm13 = vcmp.eq.s32.totalorder %v49_v15, %v490_v9  ;;  %vm81_vm14 = vcmp.eq.s32.totalorder %v48_v16, %v488_v8  ;;  %vm80_vm15 = vcmp.eq.s32.totalorder %v48_v16, %v490_v9 }
  0x27   :  { %315 = vmatprep.subr.msk.mxu0 %vm91_vm4, %v455_v12  ;;  %345 = vmatprep.subr.msk.mxu1 %vm91_vm4, %v455_v12  ;;  %vm79_vm0 = vcmp.eq.s32.totalorder %v47_v17, %v488_v8  ;;  %vm78_vm1 = vcmp.eq.s32.totalorder %v47_v17, %v490_v9  ;;  %vm77_vm2 = vcmp.eq.s32.totalorder %v46_v18, %v488_v8 }
  0x28   :  { %316 = vmatpush1.msk.msra.mxu0 %vm90_vm5, %v455_v12  ;;  %361 = vmatpush1.msk.msra.mxu1 %vm90_vm5, %v455_v12  ;;  %vm76_vm3 = vcmp.eq.s32.totalorder %v46_v18, %v490_v9  ;;  %vm75_vm4 = vcmp.eq.s32.totalorder %v45_v19, %v488_v8  ;;  %vm74_vm5 = vcmp.eq.s32.totalorder %v45_v19, %v490_v9 }
  0x29   :  { %317 = vmatprep.subr.msk.mxu0 %vm89_vm6, %v455_v12  ;;  %346 = vmatprep.subr.msk.mxu1 %vm89_vm6, %v455_v12  ;;  %vm73_vm6 = vcmp.eq.s32.totalorder %v44_v20, %v488_v8 }
  0x2a   :  { %318 = vmatpush1.msk.msra.mxu0 %vm88_vm7, %v455_v12  ;;  %362 = vmatpush1.msk.msra.mxu1 %vm88_vm7, %v455_v12  ;;  %vm72_vm7 = vcmp.eq.s32.totalorder %v44_v20, %v490_v9 }
  0x2b   :  { %319 = vmatprep.subr.msk.mxu0 %vm87_vm8, %v455_v12  ;;  %347 = vmatprep.subr.msk.mxu1 %vm87_vm8, %v455_v12  ;;  %vm71_vm8 = vcmp.eq.s32.totalorder %v43_v21, %v488_v8 }
  0x2c   :  { %320 = vmatpush1.msk.msra.mxu0 %vm86_vm9, %v455_v12  ;;  %363 = vmatpush1.msk.msra.mxu1 %vm86_vm9, %v455_v12  ;;  %vm70_vm9 = vcmp.eq.s32.totalorder %v43_v21, %v490_v9 }
  0x2d   :  { %321 = vmatprep.subr.msk.mxu0 %vm85_vm10, %v455_v12  ;;  %348 = vmatprep.subr.msk.mxu1 %vm85_vm10, %v455_v12  ;;  %vm69_vm10 = vcmp.eq.s32.totalorder %v42_v22, %v488_v8 }
  0x2e   :  { %322 = vmatpush1.msk.msra.mxu0 %vm84_vm11, %v455_v12  ;;  %364 = vmatpush1.msk.msra.mxu1 %vm84_vm11, %v455_v12  ;;  %vm68_vm11 = vcmp.eq.s32.totalorder %v42_v22, %v490_v9 }
  0x2f   :  { %323 = vmatprep.subr.msk.mxu0 %vm83_vm12, %v455_v12  ;;  %349 = vmatprep.subr.msk.mxu1 %vm83_vm12, %v455_v12  ;;  %vm67_vm12 = vcmp.eq.s32.totalorder %v41_v23, %v488_v8 }
  0x30   :  { %324 = vmatpush1.msk.msra.mxu0 %vm82_vm13, %v455_v12  ;;  %365 = vmatpush1.msk.msra.mxu1 %vm82_vm13, %v455_v12  ;;  %vm66_vm13 = vcmp.eq.s32.totalorder %v41_v23, %v490_v9 }
  0x31   :  { %325 = vmatprep.subr.msk.mxu0 %vm81_vm14, %v455_v12  ;;  %350 = vmatprep.subr.msk.mxu1 %vm81_vm14, %v455_v12  ;;  %vm65_vm14 = vcmp.eq.s32.totalorder %v482_v2, %v488_v8 }
  0x32   :  { %326 = vmatpush1.msk.msra.mxu0 %vm80_vm15, %v455_v12  ;;  %366 = vmatpush1.msk.msra.mxu1 %vm80_vm15, %v455_v12  ;;  %vm64_vm15 = vcmp.eq.s32.totalorder %v482_v2, %v490_v9 }
  0x33   :  { %327 = vmatprep.subr.msk.mxu0 %vm79_vm0, %v455_v12  ;;  %351 = vmatprep.subr.msk.mxu1 %vm79_vm0, %v455_v12 }
  0x34   :  { %328 = vmatpush1.msk.msra.mxu0 %vm78_vm1, %v455_v12  ;;  %367 = vmatpush1.msk.msra.mxu1 %vm78_vm1, %v455_v12 }
  0x35   :  { %329 = vmatprep.subr.msk.mxu0 %vm77_vm2, %v455_v12  ;;  %352 = vmatprep.subr.msk.mxu1 %vm77_vm2, %v455_v12 }
  0x36   :  { %330 = vmatpush1.msk.msra.mxu0 %vm76_vm3, %v455_v12  ;;  %368 = vmatpush1.msk.msra.mxu1 %vm76_vm3, %v455_v12 }
  0x37   :  { %331 = vmatprep.subr.msk.mxu0 %vm75_vm4, %v455_v12  ;;  %353 = vmatprep.subr.msk.mxu1 %vm75_vm4, %v455_v12 }
  0x38   :  { %332 = vmatpush1.msk.msra.mxu0 %vm74_vm5, %v455_v12  ;;  %369 = vmatpush1.msk.msra.mxu1 %vm74_vm5, %v455_v12 }
  0x39   :  { %333 = vmatprep.subr.msk.mxu0 %vm73_vm6, %v455_v12  ;;  %354 = vmatprep.subr.msk.mxu1 %vm73_vm6, %v455_v12 }
  0x3a   :  { %334 = vmatpush1.msk.msra.mxu0 %vm72_vm7, %v455_v12  ;;  %370 = vmatpush1.msk.msra.mxu1 %vm72_vm7, %v455_v12 }
  0x3b   :  { %335 = vmatprep.subr.msk.mxu0 %vm71_vm8, %v455_v12  ;;  %355 = vmatprep.subr.msk.mxu1 %vm71_vm8, %v455_v12 }
  0x3c   :  { %336 = vmatpush1.msk.msra.mxu0 %vm70_vm9, %v455_v12  ;;  %371 = vmatpush1.msk.msra.mxu1 %vm70_vm9, %v455_v12 }
  0x3d   :  { %337 = vmatprep.subr.msk.mxu0 %vm69_vm10, %v455_v12  ;;  %356 = vmatprep.subr.msk.mxu1 %vm69_vm10, %v455_v12 }
  0x3e   :  { %338 = vmatpush1.msk.msra.mxu0 %vm68_vm11, %v455_v12  ;;  %372 = vmatpush1.msk.msra.mxu1 %vm68_vm11, %v455_v12 }
  0x3f   :  { %339 = vmatprep.subr.msk.mxu0 %vm67_vm12, %v455_v12  ;;  %357 = vmatprep.subr.msk.mxu1 %vm67_vm12, %v455_v12 }
  0x40   :  { %340 = vmatpush1.msk.msra.mxu0 %vm66_vm13, %v455_v12  ;;  %373 = vmatpush1.msk.msra.mxu1 %vm66_vm13, %v455_v12 }
  0x41   :  { %341 = vmatprep.subr.msk.mxu0 %vm65_vm14, %v455_v12  ;;  %358 = vmatprep.subr.msk.mxu1 %vm65_vm14, %v455_v12 }
  0x42   :  { %342 = vmatpush1.msk.msra.mxu0 %vm64_vm15, %v455_v12  ;;  %374 = vmatpush1.msk.msra.mxu1 %vm64_vm15, %v455_v12 }
  0x43   :  { %229 = vmatmul.mubr.f32.vlgmr.msra.gmra.mxu0 %v160_v24  ;;  %241 = vmatmul.mubr.f32.vlgmr.msra.gmra.mxu1 %v162_v25 }
  0x44   :  { %234 = vmatprep.mubr.f32.mxu0 %v454_v1  ;;  %246 = vmatprep.mubr.f32.mxu1 %v454_v1 }
  0x47   :  { %235 = vmatmul.mubr.f32.gmra.mxu0 %v161_v26  ;;  %247 = vmatmul.mubr.f32.gmra.mxu1 %v163_v27 }
 0x103   :  { %v230_v28 = vpop.f32.mrf.mxu0  ;;  %v242_v29 = vpop.f32.mrf.mxu1 }
 0x104   :  { %253 = vst [vmem:[#allocation7] sm:$0xff] %v230_v28  ;;  %257 = vst [vmem:[#allocation7 + $0x20] sm:$0xff] %v242_v29 }
 0x105   :  { %v232_v30 = vpop.f32.mrf.mxu0  ;;  %v244_v31 = vpop.f32.mrf.mxu1 }
 0x106   :  { %254 = vst [vmem:[#allocation7 + $0x8] sm:$0xff] %v232_v30  ;;  %258 = vst [vmem:[#allocation7 + $0x28] sm:$0xff] %v244_v31 }
 0x107   :  { %v236_v32 = vpop.f32.mrf.mxu0  ;;  %v248_v33 = vpop.f32.mrf.mxu1 }
 0x108   :  { %255 = vst [vmem:[#allocation7 + $0x10] sm:$0xff] %v236_v32  ;;  %259 = vst [vmem:[#allocation7 + $0x30] sm:$0xff] %v248_v33 }
 0x109   :  { %v238_v34 = vpop.f32.mrf.mxu0  ;;  %v250_v35 = vpop.f32.mrf.mxu1 }
 0x10a   :  { %256 = vst [vmem:[#allocation7 + $0x18] sm:$0xff] %v238_v34  ;;  %260 = vst [vmem:[#allocation7 + $0x38] sm:$0xff] %v250_v35 }
 0x10b   :  { %435 = shalt.err (!%p432_p0)
}
 0x10c   :  { %s457_s22 = smov 256   ;;  %s458_s23 = smov 16  }
 0x10d   :  { %272 = dma.vmem_to_hbm [thread:$0]  %s267_s1, 1024, %s610_s2, [#allocation4], %s457_s22, %s457_s22, %s458_s23  }
 0x10e   :  { %448 = dma.done.wait [#allocation4], 1024  }
 0x10f   :  { %449 = vsyncadd [#allocation4], 4294966272 }
 0x110   :  { %276 = vsyncpa [#allocation3], 1 }
 0x111   :  { %277 = vsyncpa [#allocation6], 1 }
 0x112   :  { %278 = vsyncpa [#allocation4], 1 }

</bundles_post_ra>
